<compile_context>
chip_gen: v6e
topology: v6e:2x2x1
jax: 0.10.0
libtpu: 0.0.40
codegen_flags: <defaults>
</compile_context>

<pallas_src>
import functools

import jax
import jax.numpy as jnp
from jax.experimental import pallas as pl
from jax.experimental.pallas import tpu as pltpu


def _softmax_loss_kernel(x_ref, t_ref, o_ref, acc_ref, *, n_rows):
    # x_ref: (TN, C) input tile (native dtype), t_ref: (TN, 1) int32 targets,
    # o_ref: (1, 1) f32 scalar loss (SMEM), acc_ref: SMEM (2,) f32 [running total, running count].
    pid = pl.program_id(0)

    @pl.when(pid == 0)
    def _init():
        acc_ref[0] = jnp.float32(0.0)
        acc_ref[1] = jnp.float32(0.0)

    x = x_ref[...].astype(jnp.float32)            # f32 compute; HBM dtype untouched
    t = t_ref[...]                                # (TN, 1) int32
    tn, c = x.shape

    # --- softmax over classes (dim=1) ---
    m = jnp.max(x, axis=-1, keepdims=True)
    e = jnp.exp(x - m)
    denom = jnp.sum(e, axis=-1, keepdims=True)
    s = e * pl.reciprocal(denom, approx=True)     # (TN, C), reciprocal on the EUP slot

    # --- logsumexp of s (cross_entropy's internal log_softmax denominator) ---
    # s is in [0, 1] so exp(s) is in [1, e]: no overflow risk -> skip the max-subtraction pass.
    lse = jnp.log(jnp.sum(jnp.exp(s), axis=-1, keepdims=True))   # (TN, 1)

    # --- gather s[i, t_i] via one-hot select, then subtract lse on the small (TN, 1) result ---
    col = jax.lax.broadcasted_iota(jnp.int32, (tn, c), 1)
    picked_s = jnp.sum(jnp.where(col == t, s, 0.0), axis=-1, keepdims=True)   # (TN, 1)
    picked_logp = picked_s - lse                                              # (TN, 1)

    # --- ignore_index=-100 + padded-row masking, partial-sum accumulation ---
    row = pid * tn + jax.lax.broadcasted_iota(jnp.int32, (tn, 1), 0)
    valid = jnp.logical_and(t != -100, row < n_rows)             # (TN, 1) bool
    acc_ref[0] += jnp.sum(jnp.where(valid, -picked_logp, 0.0))
    acc_ref[1] += jnp.sum(valid.astype(jnp.float32))

    # --- final mean reduction: divide exactly once, at the last grid step ---
    @pl.when(pid == pl.num_programs(0) - 1)
    def _finish():
        o_ref[0, 0] = acc_ref[0] / acc_ref[1]


def softmax_loss(x, target, *, block_n=None):
    """x: (N, C) float array (any float dtype), target: (N,) int class indices (-100 = ignore).

    Returns the scalar f32 loss matching the PyTorch SoftmaxLoss module.
    """
    n, c = x.shape
    t2 = target.reshape(n, 1).astype(jnp.int32)

    if block_n is None:
        # Worst-case per-row VMEM cost: 2 pipeline buffers of the native-dtype row plus
        # ~6 f32 tile-sized temporaries (x_f32, e, s, exp(s), one-hot select, slack).
        per_row = c * (6 * 4 + 2 * x.dtype.itemsize)
        block_n = (24 * 1024 * 1024) // max(per_row, 1)
        block_n = max(8, min(block_n, 1024))
    block_n = min(block_n, n)
    if block_n < n:
        block_n = max(8, (block_n // 8) * 8)           # keep the sublane dim aligned when tiling
    grid_n = pl.cdiv(n, block_n)

    # TODO(synk): for vocab-scale C (>= ~128k rows no longer fit) add an inner C-tiled
    #             online-softmax pass so a full (TN, C) class row never has to be VMEM-resident.
    # TODO(synk): on v7x, shard the N grid across the two TensorCores (per-core partial
    #             (total, count) outputs summed in the wrapper) to use both TCs' HBM bandwidth.
    grid_spec = pltpu.PrefetchScalarGridSpec(
        num_scalar_prefetch=0,
        grid=(grid_n,),
        in_specs=[
            pl.BlockSpec((block_n, c), lambda i: (i, 0)),
            pl.BlockSpec((block_n, 1), lambda i: (i, 0)),
        ],
        out_specs=pl.BlockSpec(memory_space=pltpu.MemorySpace.SMEM),
        scratch_shapes=[pltpu.SMEM((2,), jnp.float32)],
    )

    out = pl.pallas_call(
        functools.partial(_softmax_loss_kernel, n_rows=n),
        out_shape=jax.ShapeDtypeStruct((1, 1), jnp.float32),
        grid_spec=grid_spec,
        compiler_params=pltpu.CompilerParams(
            dimension_semantics=("arbitrary",),        # sequential accumulation axis
            vmem_limit_bytes=32 * 1024 * 1024,
        ),
    )(x, t2)                                           # NOTE: no wrapper-side upcast of x
    return out[0, 0]


def _reference(x, target):
    # Pure-JAX reference with the same (double-softmax) semantics as the PyTorch module.
    s = jax.nn.softmax(x.astype(jnp.float32), axis=1)
    logp = jax.nn.log_softmax(s, axis=1)
    valid = target != -100
    safe_t = jnp.where(valid, target, 0)
    picked = jnp.take_along_axis(logp, safe_t[:, None], axis=1)[:, 0]
    return jnp.sum(jnp.where(valid, -picked, 0.0)) / jnp.sum(valid.astype(jnp.float32))


if __name__ == "__main__":
    key = jax.random.PRNGKey(0)
    kx, kt = jax.random.split(key)

    N, C = 20, 32
    x = jax.random.normal(kx, (N, C), dtype=jnp.float32)
    target = jax.random.randint(kt, (N,), 0, C, dtype=jnp.int32)
    target = target.at[3].set(-100)                    # exercise ignore_index

    ref = _reference(x, target)

    # Multi-step grid (block_n=8 -> 3 steps, last one row-padded) exercises the accumulator path.
    loss_tiled = softmax_loss(x, target, block_n=8)
    jax.block_until_ready(loss_tiled)
    assert jnp.allclose(loss_tiled, ref, atol=2e-3, rtol=2e-3), (loss_tiled, ref)

    # Default (auto) tile size: single grid step covering all rows.
    loss_auto = softmax_loss(x, target)
    jax.block_until_ready(loss_auto)
    assert jnp.allclose(loss_auto, ref, atol=2e-3, rtol=2e-3), (loss_auto, ref)

    # bf16 input stays bf16 in HBM; the f32 cast happens inside the kernel only.
    loss_bf16 = softmax_loss(x.astype(jnp.bfloat16), target, block_n=8)
    jax.block_until_ready(loss_bf16)
    assert jnp.allclose(loss_bf16, ref, atol=5e-2, rtol=5e-2), (loss_bf16, ref)

    print("KERNEL_OK")
</pallas_src>

<mosaic_0001>
module attributes {stable_mosaic.version = 11 : i64} {
  func.func @_softmax_loss_kernel(%arg0: i32, %arg1: memref<8x32xf32, #tpu.memory_space<vmem>>, %arg2: memref<8x1xi32, #tpu.memory_space<vmem>>, %arg3: memref<1x1xf32, #tpu.memory_space<smem>>, %arg4: memref<2xf32, #tpu.memory_space<smem>>) attributes {dimension_semantics = [#tpu.dimension_semantics<arbitrary>], iteration_bounds = array<i64: 3>, scalar_prefetch = 0 : i64, scratch_operands = 1 : i64, tpu.core_type = #tpu.core_type<tc>, window_params = [{transform_indices = @transform_0, window_bounds = array<i64: 8, 32>}, {transform_indices = @transform_1, window_bounds = array<i64: 8, 1>}, {transform_indices = @transform_2, window_bounds = array<i64: 1, 1>}]} {
    %c0_i32 = arith.constant 0 : i32
    %0 = arith.cmpi eq, %arg0, %c0_i32 : i32
    %1 = arith.extui %0 : i1 to i32
    %c0_i32_0 = arith.constant 0 : i32
    %2 = arith.cmpi ne, %1, %c0_i32_0 : i32
    scf.if %2 {
      %cst_16 = arith.constant 0.000000e+00 : f32
      %c0_17 = arith.constant 0 : index
      %59 = memref.load %arg4[%c0_17] : memref<2xf32, #tpu.memory_space<smem>>
      memref.store %cst_16, %arg4[%c0_17] : memref<2xf32, #tpu.memory_space<smem>>
      %cst_18 = arith.constant 0.000000e+00 : f32
      %c1_19 = arith.constant 1 : index
      %60 = memref.load %arg4[%c1_19] : memref<2xf32, #tpu.memory_space<smem>>
      memref.store %cst_18, %arg4[%c1_19] : memref<2xf32, #tpu.memory_space<smem>>
    } else {
    }
    %c0 = arith.constant 0 : index
    %c0_1 = arith.constant 0 : index
    %3 = vector.load %arg1[%c0, %c0_1] : memref<8x32xf32, #tpu.memory_space<vmem>>, vector<8x32xf32>
    %c0_2 = arith.constant 0 : index
    %c0_3 = arith.constant 0 : index
    %4 = vector.load %arg2[%c0_2, %c0_3] : memref<8x1xi32, #tpu.memory_space<vmem>>, vector<8x1xi32>
    %cst = arith.constant dense<0xFF800000> : vector<8xf32>
    %5 = vector.multi_reduction <maximumf>, %3, %cst [1] : vector<8x32xf32> to vector<8xf32>
    %6 = vector.shape_cast %5 : vector<8xf32> to vector<8x1xf32>
    %7 = vector.broadcast %6 : vector<8x1xf32> to vector<8x32xf32>
    %8 = arith.subf %3, %7 : vector<8x32xf32>
    %9 = math.exp %8 : vector<8x32xf32>
    %cst_4 = arith.constant dense<0.000000e+00> : vector<8xf32>
    %10 = vector.multi_reduction <add>, %9, %cst_4 [1] : vector<8x32xf32> to vector<8xf32>
    %11 = vector.shape_cast %10 : vector<8xf32> to vector<8x1xf32>
    %12 = tpu.reciprocal %11 {approx = true} : vector<8x1xf32> -> vector<8x1xf32>
    %13 = vector.broadcast %12 : vector<8x1xf32> to vector<8x32xf32>
    %14 = arith.mulf %9, %13 : vector<8x32xf32>
    %15 = math.exp %14 : vector<8x32xf32>
    %cst_5 = arith.constant dense<0.000000e+00> : vector<8xf32>
    %16 = vector.multi_reduction <add>, %15, %cst_5 [1] : vector<8x32xf32> to vector<8xf32>
    %17 = vector.shape_cast %16 : vector<8xf32> to vector<8x1xf32>
    %18 = math.log %17 : vector<8x1xf32>
    %19 = tpu.iota {dimensions = array<i32: 1>} : vector<8x32xi32>
    %20 = vector.broadcast %4 : vector<8x1xi32> to vector<8x32xi32>
    %21 = arith.cmpi eq, %19, %20 : vector<8x32xi32>
    %cst_6 = arith.constant 0.000000e+00 : f32
    %22 = vector.broadcast %cst_6 : f32 to vector<8x32xf32>
    %23 = arith.select %21, %14, %22 : vector<8x32xi1>, vector<8x32xf32>
    %cst_7 = arith.constant dense<0.000000e+00> : vector<8xf32>
    %24 = vector.multi_reduction <add>, %23, %cst_7 [1] : vector<8x32xf32> to vector<8xf32>
    %25 = vector.shape_cast %24 : vector<8xf32> to vector<8x1xf32>
    %26 = arith.subf %25, %18 : vector<8x1xf32>
    %c8_i32 = arith.constant 8 : i32
    %27 = arith.muli %arg0, %c8_i32 : i32
    %28 = tpu.iota {dimensions = array<i32: 0>} : vector<8x1xi32>
    %29 = vector.broadcast %27 : i32 to vector<8x1xi32>
    %30 = arith.addi %29, %28 : vector<8x1xi32>
    %c-100_i32 = arith.constant -100 : i32
    %31 = vector.broadcast %c-100_i32 : i32 to vector<8x1xi32>
    %32 = arith.cmpi ne, %4, %31 : vector<8x1xi32>
    %c20_i32 = arith.constant 20 : i32
    %33 = vector.broadcast %c20_i32 : i32 to vector<8x1xi32>
    %34 = arith.cmpi slt, %30, %33 : vector<8x1xi32>
    %35 = arith.andi %32, %34 : vector<8x1xi1>
    %c0_8 = arith.constant 0 : index
    %36 = memref.load %arg4[%c0_8] : memref<2xf32, #tpu.memory_space<smem>>
    %cst_9 = arith.constant 0.000000e+00 : f32
    %37 = vector.broadcast %cst_9 : f32 to vector<8x1xf32>
    %38 = arith.subf %37, %26 : vector<8x1xf32>
    %cst_10 = arith.constant 0.000000e+00 : f32
    %39 = vector.broadcast %cst_10 : f32 to vector<8x1xf32>
    %40 = arith.select %35, %38, %39 : vector<8x1xi1>, vector<8x1xf32>
    %41 = vector.shape_cast %40 : vector<8x1xf32> to vector<1x8x1xf32>
    %cst_11 = arith.constant dense<0.000000e+00> : vector<1xf32>
    %42 = vector.multi_reduction <add>, %41, %cst_11 [1, 2] : vector<1x8x1xf32> to vector<1xf32>
    %43 = vector.shape_cast %42 : vector<1xf32> to vector<1x1x1xf32>
    %44 = vector.extract %43[0, 0, 0] : f32 from vector<1x1x1xf32>
    %45 = arith.addf %36, %44 : f32
    %c0_12 = arith.constant 0 : index
    %46 = memref.load %arg4[%c0_12] : memref<2xf32, #tpu.memory_space<smem>>
    memref.store %45, %arg4[%c0_12] : memref<2xf32, #tpu.memory_space<smem>>
    %c1 = arith.constant 1 : index
    %47 = memref.load %arg4[%c1] : memref<2xf32, #tpu.memory_space<smem>>
    %48 = arith.extui %35 : vector<8x1xi1> to vector<8x1xi32>
    %49 = arith.sitofp %48 : vector<8x1xi32> to vector<8x1xf32>
    %50 = vector.shape_cast %49 : vector<8x1xf32> to vector<1x8x1xf32>
    %cst_13 = arith.constant dense<0.000000e+00> : vector<1xf32>
    %51 = vector.multi_reduction <add>, %50, %cst_13 [1, 2] : vector<1x8x1xf32> to vector<1xf32>
    %52 = vector.shape_cast %51 : vector<1xf32> to vector<1x1x1xf32>
    %53 = vector.extract %52[0, 0, 0] : f32 from vector<1x1x1xf32>
    %54 = arith.addf %47, %53 : f32
    %c1_14 = arith.constant 1 : index
    %55 = memref.load %arg4[%c1_14] : memref<2xf32, #tpu.memory_space<smem>>
    memref.store %54, %arg4[%c1_14] : memref<2xf32, #tpu.memory_space<smem>>
    %c2_i32 = arith.constant 2 : i32
    %56 = arith.cmpi eq, %arg0, %c2_i32 : i32
    %57 = arith.extui %56 : i1 to i32
    %c0_i32_15 = arith.constant 0 : i32
    %58 = arith.cmpi ne, %57, %c0_i32_15 : i32
    scf.if %58 {
      %c0_16 = arith.constant 0 : index
      %59 = memref.load %arg4[%c0_16] : memref<2xf32, #tpu.memory_space<smem>>
      %c1_17 = arith.constant 1 : index
      %60 = memref.load %arg4[%c1_17] : memref<2xf32, #tpu.memory_space<smem>>
      %61 = arith.divf %59, %60 : f32
      %c0_18 = arith.constant 0 : index
      %c0_19 = arith.constant 0 : index
      %62 = memref.load %arg3[%c0_18, %c0_19] : memref<1x1xf32, #tpu.memory_space<smem>>
      memref.store %61, %arg3[%c0_18, %c0_19] : memref<1x1xf32, #tpu.memory_space<smem>>
    } else {
    }
    return
  }
  func.func @transform_0(%arg0: i32) -> (i32, i32) {
    %c0_i32 = arith.constant 0 : i32
    %c0_i32_0 = arith.constant 0 : i32
    return %arg0, %c0_i32 : i32, i32
  }
  func.func @transform_1(%arg0: i32) -> (i32, i32) {
    %c0_i32 = arith.constant 0 : i32
    %c0_i32_0 = arith.constant 0 : i32
    return %arg0, %c0_i32 : i32, i32
  }
  func.func @transform_2(%arg0: i32) -> (i32, i32) {
    %c0_i32 = arith.constant 0 : i32
    %c0_i32_0 = arith.constant 0 : i32
    %c0_i32_1 = arith.constant 0 : i32
    return %c0_i32, %c0_i32_0 : i32, i32
  }
}

</mosaic_0001>

<bundles_post_ra>
// kernel: tpu_custom_call.1
= control target key start
LH: loop header
LB: loop body
LE: loop exit
PB: predicated region body
PF: predicated region fallthrough
CT: control target
= control target key end

     0   :  { %7 = vsyncpa [#allocation4], 0  ;;  %s391_s9 = smov 0   ;;  %s423_s0 = inlined_call_operand.vmem [shape: f32[20,32], index: 0, kind: input, shape index: {}]   ;;  %s424_s1 = inlined_call_operand.vmem [shape: s32[20,1], index: 1, kind: input, shape index: {}]   ;;  %s425_s2 = inlined_call_operand.hbm [shape: f32[1,1], index: 2, kind: output, shape index: {}]  }
   0x1 LB: > { %s397_s10 = sadd.s32 4294967295, %s370_s9   ;;  %p297_p0 = scmp.ge.s32.totalorder %s370_s9, 1  ;;  %s370_s9 = sphi %s391_s9, %s13_s9  }
   0x2   : > { %p116_p1 = scmp.lt.s32.totalorder %s370_s9, 4 }
   0x4   : > { %p117_p2 = pnand %p297_p0, %p116_p1 }
   0x5   : > { %p136_p3 = scmp.lt.s32.totalorder (!%p117_p2), %s397_s10, 2  ;;  %s301_s19 = sshll.u32 (!%p117_p2), %s397_s10, 3 }
   0x6   : > { %120 = sbr.rel (%p117_p2) target bundleno = 792 (0x318), region = 28  ;;  %p323_p4 = scmp.eq.s32.totalorder (!%p117_p2), %s397_s10, 0 }
   0x7   : > { %s374_s20 = smov (!%p117_p2), 0.0   ;;  %p304_p5 = scmp.ne.s32.totalorder (!%p117_p2), %s397_s10, 2 }
   0xb   : > { %s137_s11 = scalar_select %p136_p3, %s397_s10, 2  ;;  %vm154_vm0 = vcmask 261120   ;;  %v372_v2 = vmov 0   ;;  %v173_v10 = vlaneseq  ;;  %v187_v22 = vstv %s301_s19 }
   0xc   : > { %338 = vset.pattern.permute.xlu1 %v372_v2  ;;  %339 = vset.pattern.permute.xlu0 %v372_v2  ;;  %vm195_vm5 = vcmask 7168   ;;  %v373_v30 = vmov 0.0   ;;  %317 = sst [smem:[#allocation2]] (%p323_p4), %s374_s20 }
   0xd   : > { %s298_s12 = sshll.u32 %s137_s11, 3  ;;  %v174_v11 = vand.u32 127, %v173_v10  ;;  %v186_v21 = vshrl.u32 %v173_v10, 7  ;;  %318 = sst [smem:[#allocation2 + $0x1]] (%p323_p4), %s374_s20 }
   0xe   : > { %s139_s15 = scalar_lea.vmem %s423_s0, %s298_s12  ;;  %s143_s18 = scalar_lea.vmem %s424_s1, %s298_s12 }
   0xf   : > { %v152_v0 = vld [vmem:[%s139_s15] sm:$0xff]  ;;  %v188_v23 = vadd.s32 %v187_v22, %v186_v21  ;;  %s192_s21 = sld [smem:[#allocation2]] }
  0x10   : > { %v155_v1 = vsel %vm154_vm0, %v152_v0, -inf  ;;  %v153_v3 = vld [vmem:[%s143_s18] sm:$0xff]  ;;  %s302_s22 = sld [smem:[#allocation2 + $0x1]] }
  0x11   : > { %156 = vmax.xlane.f32.xlu0 %v155_v1  ;;  %176 = vperm.xlu1 %338, %v153_v3   ;;  %vm189_vm2 = vcmp.ne.s32.totalorder %v153_v3, 4294967196  ;;  %vm190_vm3 = vcmp.lt.s32.totalorder %v188_v23, 20 }
  0x12   : > { %vm191_vm4 = vmand %vm189_vm2, %vm190_vm3 }
  0x13   : > { %v303_v31 = vsel %vm191_vm4, 1.0, %v373_v30 }
  0x14   : > { %v212_v33 = vsel %vm195_vm5, %v303_v31, 0.0 }
  0x8c   : > { %v177_v12 = vpop.permute.xlu1 %176 }
  0x8d   : > { %vm178_vm1 = vcmp.eq.s32.totalorder %v174_v11, %v177_v12 }
  0x9a   : > { %v157_v4 = vpop.xlane.xlu0 %156 }
  0x9b   : > { %v158_v5 = vsub.f32 %v152_v0, %v157_v4 }
  0x9d   : > { %v159_v6 = vmul.f32 1.442695, %v158_v5 }
  0x9f   : > { %340 = vpow2.f32 %v159_v6 }
  0xac   : > { %v341_v7 = vpop.eup %340 }
  0xad   : > { %v161_v8 = vsel %vm154_vm0, %v341_v7, 0.0 }
  0xae   : > { %162 = vadd.xlane.f32.xlu0 %v161_v8 }
 0x137   : > { %v163_v9 = vpop.xlane.xlu0 %162 }
 0x138   : > { %342 = vrcp.f32 %v163_v9 }
 0x145   : > { %v343_v13 = vpop.eup %342 }
 0x146   : > { %v165_v14 = vmul.f32 %v343_v13, %v341_v7 }
 0x148   : > { %v179_v15 = vsel %vm178_vm1, %v165_v14, 0.0  ;;  %v166_v16 = vmul.f32 1.442695, %v165_v14 }
 0x149   : > { %v180_v17 = vsel %vm154_vm0, %v179_v15, 0.0 }
 0x14a   : > { %181 = vadd.xlane.f32.xlu0 %v180_v17  ;;  %344 = vpow2.f32 %v166_v16 }
 0x157   : > { %v345_v18 = vpop.eup %344 }
 0x158   : > { %v168_v19 = vsel %vm154_vm0, %v345_v18, 0.0 }
 0x159   : > { %169 = vadd.xlane.f32.xlu1 %v168_v19 }
 0x1d3   : > { %v182_v26 = vpop.xlane.xlu0 %181 }
 0x1e2   : > { %v170_v20 = vpop.xlane.xlu1 %169 }
 0x1e3   : > { %346 = vlog2.f32 %v170_v20 }
 0x1f0   : > { %v347_v24 = vpop.eup %346 }
 0x1f1   : > { %v172_v25 = vmul.f32 0.6931472, %v347_v24 }
 0x1f3   : > { %v183_v27 = vsub.f32 %v182_v26, %v172_v25 }
 0x1f5   : > { %v193_v28 = vsub.f32 0.0, %v183_v27 }
 0x1f7   : > { %v194_v29 = vsel %vm191_vm4, %v193_v28, 0.0 }
 0x1f8   : > { %v196_v32 = vsel %vm195_vm5, %v194_v29, 0.0 }
 0x1f9   : > { %197 = vadd.xlane.f32.xlu0 %v196_v32 }
 0x1fd   : > { %213 = vadd.xlane.f32.xlu0 %v212_v33 }
 0x282   : > { %v198_v34 = vpop.xlane.xlu0 %197 }
 0x283   : > { %v199_v35 = vrot.slane %v198_v34, 4 }
 0x285   : > { %v200_v36 = vadd.f32 %v199_v35, %v198_v34 }
 0x286   : > { %v214_v37 = vpop.xlane.xlu0 %213 }
 0x287   : > { %v201_v38 = vrot.slane %v200_v36, 2  ;;  %v215_v39 = vrot.slane %v214_v37, 4 }
 0x289   : > { %v216_v40 = vadd.f32 %v215_v39, %v214_v37  ;;  %v202_v41 = vadd.f32 %v201_v38, %v200_v36 }
 0x28b   : > { %v217_v42 = vrot.slane %v216_v40, 2  ;;  %v203_v43 = vrot.slane %v202_v41, 1 }
 0x28d   : > { %v218_v44 = vadd.f32 %v217_v42, %v216_v40  ;;  %v204_v45 = vadd.f32 %v203_v43, %v202_v41 }
 0x28f   : > { %310 = vpush %v204_v45  ;;  %v219_v46 = vrot.slane %v218_v44, 1 }
 0x291   : > { %v220_v47 = vadd.f32 %v219_v46, %v218_v44 }
 0x293   : > { %312 = vpush %v220_v47 }
 0x2c0   : > { %s311_s23 = spop %310 }
 0x2c1   : > { %s206_s24 = sadd.f32 %s311_s23, %s192_s21 }
 0x2c3   : > { %208 = sst [smem:[#allocation2]] %s206_s24  ;;  %228 = sbr.rel (%p304_p5) target bundleno = 786 (0x312), region = 36 }
 0x2c4   : > { %s313_s25 = spop %312  ;;  %s229_s28 = sld [smem:[#allocation2]] (!%p304_p5) }
 0x2c5   : > { %s222_s26 = sadd.f32 %s313_s25, %s302_s22 }
 0x2c7   : > { %224 = sst [smem:[#allocation2 + $0x1]] %s222_s26 }
 0x2c8   : > { %s305_s27 = sld [smem:[#allocation2 + $0x1]] }
 0x2ce   : > { %v231_v48 = vstv %s305_s27 }
 0x2cf   : > { %348 = vrcp.f32 %v231_v48 }
 0x2dc   : > { %v349_v49 = vpop.eup %348 }
 0x2dd   : > { %314 = vpush %v349_v49 }
 0x30e   : > { %s315_s29 = spop %314 }
 0x30f   : > { %s234_s30 = smul.f32 %s315_s29, %s229_s28 }
 0x311   : > { %236 = sst [smem:[#allocation3]] %s234_s30 }
 0x312 PF: > { %p324_p6 = scmp.eq.s32.totalorder %s397_s10, 2  ;;  %s375_s3 = smov [#allocation3]  }
 0x314   : > { %320 = dma.smem_to_hbm (%p324_p6), %s375_s3, 16, %s425_s2, [#allocation4]  }
 0x315   : > { %365 = dma.done.wait (%p324_p6), [#allocation4], 16  }
 0x316   : > { %367 = vsyncadd (%p324_p6), [#allocation4], 4294967280 }
 0x317   : > { %250 = sfence }
 0x318 PF: > { %s13_s9 = sadd.s32 1, %s370_s9  }
 0x319   : > { %p10_p7 = scmp.ge.s32.totalorder %s13_s9, 5  }
 0x31b   :  { %12 = sbr.rel (!%p10_p7) target bundleno = 1 (0x1), region = 71 }
 0x320   :  { %256 = vsyncpa [#allocation4], 1 }
 0x321   :  { %258 = vsyncpa [#allocation4 + $0x1], 1 }

</bundles_post_ra>
